<compile_context>
chip_gen: v7x
topology: tpu7x:2x2x1
jax: 0.10.0
libtpu: 0.0.40
codegen_flags: <defaults>
</compile_context>

<pallas_src>
import functools
import math

import jax
import jax.numpy as jnp
import numpy as np
from jax import lax
from jax.experimental import pallas as pl
from jax.experimental.pallas import tpu as pltpu


def _round_up(x, m):
    return ((x + m - 1) // m) * m


def _choose_tile_m(M, cap):
    """Largest divisor of M that is a multiple of 8 and <= cap, preferring at
    least 2 grid steps (both v7x TensorCores).  None if M is not a multiple
    of 8 (caller falls back to padding)."""
    if M % 8 != 0:
        return None
    limit = min(cap, M)
    if M >= 16:
        limit = min(limit, M // 2)   # leave >= 2 grid steps when possible
    limit = max(limit, 8)
    best = 8
    for d in range(8, limit + 1, 8):
        if M % d == 0:
            best = d
    return best


def _proj_ln_kernel(p_ref, w_ref, prm_ref, o_ref, *, inv_e, eps, e_valid):
    # p_ref:   (TM, K)      bf16  patch tile (pipelined over the grid)
    # w_ref:   (K,  E_pad)  bf16  projection weight (VMEM resident)
    # prm_ref: (8,  E_pad)  f32   row0=conv bias, row1=LN gamma, row2=LN beta
    # o_ref:   (TM, E_pad)  out dtype
    y = jnp.dot(p_ref[...], w_ref[...], preferred_element_type=jnp.float32)
    prm = prm_ref[...]
    y = y + prm[0:1, :]                       # padded E columns stay exactly 0
    mu = jnp.sum(y, axis=-1, keepdims=True) * inv_e
    yc = y - mu
    if e_valid is not None:
        # Zero the padded embed columns so the centered variance (and the
        # padded output columns) stay exact.
        col = lax.broadcasted_iota(jnp.int32, yc.shape, 1)
        yc = jnp.where(col < e_valid, yc, 0.0)
    var = jnp.sum(yc * yc, axis=-1, keepdims=True) * inv_e
    inv_std = lax.rsqrt(var + eps)
    o_ref[...] = (yc * inv_std * prm[1:2, :] + prm[2:3, :]).astype(o_ref.dtype)


def _run_proj_ln(patches, w_mat, params, *, tm, out_dtype, eps, inv_e, e_valid):
    M, K = patches.shape
    E_pad = w_mat.shape[1]
    out_bytes = jnp.dtype(out_dtype).itemsize
    kernel = functools.partial(_proj_ln_kernel, inv_e=inv_e, eps=eps,
                               e_valid=e_valid)
    cost = pl.CostEstimate(
        flops=2 * M * K * E_pad,
        transcendentals=M,
        bytes_accessed=(M * K * 2 + K * E_pad * 2 + 8 * E_pad * 4
                        + M * E_pad * out_bytes))
    return pl.pallas_call(
        kernel,
        out_shape=jax.ShapeDtypeStruct((M, E_pad), out_dtype),
        grid_spec=pltpu.PrefetchScalarGridSpec(
            num_scalar_prefetch=0,
            grid=(M // tm,),
            in_specs=[
                pl.BlockSpec((tm, K), lambda i: (i, 0)),      # patch tile
                pl.BlockSpec((K, E_pad), lambda i: (0, 0)),   # weight (resident)
                pl.BlockSpec((8, E_pad), lambda i: (0, 0)),   # packed bias/gamma/beta
            ],
            out_specs=pl.BlockSpec((tm, E_pad), lambda i: (i, 0)),
        ),
        compiler_params=pltpu.CompilerParams(
            dimension_semantics=("parallel",),     # megacore shard on v7x
            vmem_limit_bytes=48 * 1024 * 1024),    # headroom under v7x 64 MiB
        cost_estimate=cost,
    )(patches, w_mat, params)


def overlap_patch_embed(x, w, b, gamma, beta, *, patch_size=7, stride=4,
                        tile_m=1024, eps=1e-5, out_dtype=jnp.bfloat16):
    """x: (B, C, H, W) NCHW; w: (E, C, kh, kw); b/gamma/beta: (E,).

    Returns (tokens (B, Hout*Wout, E) in `out_dtype`, Hout, Wout)."""
    B, C, H, W = x.shape
    E = w.shape[0]
    kh = kw = patch_size
    pad = patch_size // 2
    Hout = (H + 2 * pad - kh) // stride + 1
    Wout = (W + 2 * pad - kw) // stride + 1
    K = C * kh * kw
    M = B * Hout * Wout

    # --- patch extraction: single XLA op, channels-last, bf16 ---
    # Output (B, Hout, Wout, C*kh*kw); feature dim ordered (C, kh, kw) with C
    # slowest -> matches w.reshape(E, C*kh*kw).  NOTE: the conv itself runs in
    # bf16 (intentional precision difference vs. the f32 PyTorch module).
    patches = lax.conv_general_dilated_patches(
        x.astype(jnp.bfloat16),
        filter_shape=(kh, kw),
        window_strides=(stride, stride),
        padding=((pad, pad), (pad, pad)),
        dimension_numbers=("NCHW", "OIHW", "NHWC"))
    patches = patches.reshape(M, K)        # free reshape (collapse leading dims)

    # --- parameters (tiny; padding these is cheap) ---
    E_pad = _round_up(E, 128)              # lane-dense output stores
    w_mat = jnp.pad(w.reshape(E, K).T.astype(jnp.bfloat16),
                    ((0, 0), (0, E_pad - E)))                  # (K, E_pad)
    params = jnp.zeros((8, E_pad), jnp.float32)
    params = params.at[0, :E].set(b.astype(jnp.float32))       # conv bias
    params = params.at[1, :E].set(gamma.astype(jnp.float32))   # LN weight
    params = params.at[2, :E].set(beta.astype(jnp.float32))    # LN bias

    # --- token tiling: TM divides M -> no M padding, no output row slice ---
    TM = _choose_tile_m(M, tile_m)
    if TM is None:
        # Rare fallback (M not a multiple of 8): pad token rows once.
        TM = min(tile_m, _round_up(M, 8))
        M_run = _round_up(M, TM)
        patches = jnp.pad(patches, ((0, M_run - M), (0, 0)))
    else:
        M_run = M

    run = functools.partial(_run_proj_ln, tm=TM, out_dtype=out_dtype, eps=eps,
                            inv_e=1.0 / E,
                            e_valid=None if E_pad == E else E)
    try:
        out = run(patches, w_mat, params)              # unpadded-K fast path
    except Exception:
        # Safety net: if this Mosaic build rejects the unaligned-K matmul,
        # zero-pad K to a multiple of 128 (extra copy, identical numerics).
        K_pad = _round_up(K, 128)
        out = run(jnp.pad(patches, ((0, 0), (0, K_pad - K))),
                  jnp.pad(w_mat, ((0, K_pad - K), (0, 0))),
                  params)

    if M_run == M and E_pad == E:
        tokens = out.reshape(B, Hout * Wout, E)        # free reshape, no copy
    else:
        tokens = out[:M, :E].reshape(B, Hout * Wout, E)
    return tokens, Hout, Wout


def _reference(x, w, b, gamma, beta, patch_size, stride, eps=1e-5):
    """Pure-JAX f32 reference: Conv2d(stride, pad=patch//2) -> flatten -> LN."""
    pad = patch_size // 2
    y = lax.conv_general_dilated(
        x, w, window_strides=(stride, stride),
        padding=((pad, pad), (pad, pad)),
        dimension_numbers=("NCHW", "OIHW", "NCHW"))
    y = y + b.reshape(1, -1, 1, 1)
    B, E, Hh, Ww = y.shape
    t = y.reshape(B, E, Hh * Ww).transpose(0, 2, 1)
    mu = jnp.mean(t, axis=-1, keepdims=True)
    var = jnp.mean((t - mu) ** 2, axis=-1, keepdims=True)
    t = (t - mu) / jnp.sqrt(var + eps) * gamma + beta
    return t, Hh, Ww


if __name__ == "__main__":
    # Small shapes consistent with the module's forward.
    B, C, H, W = 2, 4, 16, 16
    patch_size, stride, embed_dim = 7, 4, 32

    key = jax.random.PRNGKey(0)
    kx, kw_key = jax.random.split(key)

    x = jax.random.normal(kx, (B, C, H, W), dtype=jnp.float32)

    # Deterministic init mirroring _init_weights:
    #   Conv2d: weight ~ N(0, sqrt(2/fan_out)), bias = 0
    #   LayerNorm: weight = 1, bias = 0
    fan_out = patch_size * patch_size * embed_dim
    w = jax.random.normal(kw_key, (embed_dim, C, patch_size, patch_size),
                          dtype=jnp.float32) * math.sqrt(2.0 / fan_out)
    b = jnp.zeros((embed_dim,), jnp.float32)
    gamma = jnp.ones((embed_dim,), jnp.float32)
    beta = jnp.zeros((embed_dim,), jnp.float32)

    tokens, Hout, Wout = overlap_patch_embed(
        x, w, b, gamma, beta, patch_size=patch_size, stride=stride)
    tokens = jax.block_until_ready(tokens)

    assert tokens.shape == (B, Hout * Wout, embed_dim), tokens.shape
    assert (Hout, Wout) == (4, 4)

    ref, Hr, Wr = _reference(x, w, b, gamma, beta, patch_size, stride)
    assert (Hr, Wr) == (Hout, Wout)
    # bf16 matmul inputs + bf16 output store with f32 accumulation/LN ->
    # loose-ish tolerance.
    np.testing.assert_allclose(np.asarray(tokens.astype(jnp.float32)),
                               np.asarray(ref), rtol=5e-2, atol=5e-2)
    print("KERNEL_OK")
</pallas_src>

<mosaic_0001>
module attributes {stable_mosaic.version = 11 : i64} {
  func.func @_proj_ln_kernel(%arg0: i32, %arg1: memref<16x196xbf16, #tpu.memory_space<vmem>>, %arg2: memref<196x128xbf16, #tpu.memory_space<vmem>>, %arg3: memref<8x128xf32, #tpu.memory_space<vmem>>, %arg4: memref<16x128xbf16, #tpu.memory_space<vmem>>) attributes {dimension_semantics = [#tpu.dimension_semantics<parallel>], iteration_bounds = array<i64: 2>, scalar_prefetch = 0 : i64, scratch_operands = 0 : i64, tpu.core_type = #tpu.core_type<tc>, window_params = [{transform_indices = @transform_0, window_bounds = array<i64: 16, 196>}, {pipeline_mode = #tpu.pipeline_mode<synchronous>, transform_indices = @transform_1, window_bounds = array<i64: 196, 128>}, {pipeline_mode = #tpu.pipeline_mode<synchronous>, transform_indices = @transform_2, window_bounds = array<i64: 8, 128>}, {transform_indices = @transform_3, window_bounds = array<i64: 16, 128>}]} {
    %c0 = arith.constant 0 : index
    %c0_0 = arith.constant 0 : index
    %0 = vector.load %arg1[%c0, %c0_0] : memref<16x196xbf16, #tpu.memory_space<vmem>>, vector<16x196xbf16>
    %c0_1 = arith.constant 0 : index
    %c0_2 = arith.constant 0 : index
    %1 = vector.load %arg2[%c0_1, %c0_2] : memref<196x128xbf16, #tpu.memory_space<vmem>>, vector<196x128xbf16>
    %cst = arith.constant dense<0.000000e+00> : vector<16x128xf32>
    %2 = tpu.matmul %0, %1, %cst {dimension_numbers = #tpu.dot_dimension_numbers<[1], [0], [0], [1], [0, 0, 1, 1], [], []>} : vector<16x196xbf16>, vector<196x128xbf16>, vector<16x128xf32> -> vector<16x128xf32>
    %c0_3 = arith.constant 0 : index
    %c0_4 = arith.constant 0 : index
    %3 = vector.load %arg3[%c0_3, %c0_4] : memref<8x128xf32, #tpu.memory_space<vmem>>, vector<8x128xf32>
    %4 = vector.extract_strided_slice %3 {offsets = [0, 0], sizes = [1, 128], strides = [1, 1]} : vector<8x128xf32> to vector<1x128xf32>
    %5 = vector.broadcast %4 : vector<1x128xf32> to vector<16x128xf32>
    %6 = arith.addf %2, %5 : vector<16x128xf32>
    %cst_5 = arith.constant dense<0.000000e+00> : vector<16xf32>
    %7 = vector.multi_reduction <add>, %6, %cst_5 [1] : vector<16x128xf32> to vector<16xf32>
    %8 = vector.shape_cast %7 : vector<16xf32> to vector<16x1xf32>
    %cst_6 = arith.constant 3.125000e-02 : f32
    %9 = vector.broadcast %cst_6 : f32 to vector<16x1xf32>
    %10 = arith.mulf %8, %9 : vector<16x1xf32>
    %11 = vector.broadcast %10 : vector<16x1xf32> to vector<16x128xf32>
    %12 = arith.subf %6, %11 : vector<16x128xf32>
    %13 = tpu.iota {dimensions = array<i32: 1>} : vector<16x128xi32>
    %c32_i32 = arith.constant 32 : i32
    %14 = vector.broadcast %c32_i32 : i32 to vector<16x128xi32>
    %15 = arith.cmpi slt, %13, %14 : vector<16x128xi32>
    %cst_7 = arith.constant 0.000000e+00 : f32
    %16 = vector.broadcast %cst_7 : f32 to vector<16x128xf32>
    %17 = arith.select %15, %12, %16 : vector<16x128xi1>, vector<16x128xf32>
    %18 = arith.mulf %17, %17 : vector<16x128xf32>
    %cst_8 = arith.constant dense<0.000000e+00> : vector<16xf32>
    %19 = vector.multi_reduction <add>, %18, %cst_8 [1] : vector<16x128xf32> to vector<16xf32>
    %20 = vector.shape_cast %19 : vector<16xf32> to vector<16x1xf32>
    %cst_9 = arith.constant 3.125000e-02 : f32
    %21 = vector.broadcast %cst_9 : f32 to vector<16x1xf32>
    %22 = arith.mulf %20, %21 : vector<16x1xf32>
    %cst_10 = arith.constant 9.99999974E-6 : f32
    %23 = vector.broadcast %cst_10 : f32 to vector<16x1xf32>
    %24 = arith.addf %22, %23 : vector<16x1xf32>
    %25 = math.rsqrt %24 : vector<16x1xf32>
    %26 = vector.broadcast %25 : vector<16x1xf32> to vector<16x128xf32>
    %27 = arith.mulf %17, %26 : vector<16x128xf32>
    %28 = vector.extract_strided_slice %3 {offsets = [1, 0], sizes = [1, 128], strides = [1, 1]} : vector<8x128xf32> to vector<1x128xf32>
    %29 = vector.broadcast %28 : vector<1x128xf32> to vector<16x128xf32>
    %30 = arith.mulf %27, %29 : vector<16x128xf32>
    %31 = vector.extract_strided_slice %3 {offsets = [2, 0], sizes = [1, 128], strides = [1, 1]} : vector<8x128xf32> to vector<1x128xf32>
    %32 = vector.broadcast %31 : vector<1x128xf32> to vector<16x128xf32>
    %33 = arith.addf %30, %32 : vector<16x128xf32>
    %34 = arith.truncf %33 : vector<16x128xf32> to vector<16x128xbf16>
    %c0_11 = arith.constant 0 : index
    %c0_12 = arith.constant 0 : index
    %35 = vector.load %arg4[%c0_11, %c0_12] : memref<16x128xbf16, #tpu.memory_space<vmem>>, vector<16x128xbf16>
    tpu.vector_store %arg4[%c0_11, %c0_12], %34 {strides = array<i32>} : memref<16x128xbf16, #tpu.memory_space<vmem>>, vector<16x128xbf16>,
    return
  }
  func.func @transform_0(%arg0: i32) -> (i32, i32) {
    %c0_i32 = arith.constant 0 : i32
    %c0_i32_0 = arith.constant 0 : i32
    return %arg0, %c0_i32 : i32, i32
  }
  func.func @transform_1(%arg0: i32) -> (i32, i32) {
    %c0_i32 = arith.constant 0 : i32
    %c0_i32_0 = arith.constant 0 : i32
    %c0_i32_1 = arith.constant 0 : i32
    return %c0_i32, %c0_i32_0 : i32, i32
  }
  func.func @transform_2(%arg0: i32) -> (i32, i32) {
    %c0_i32 = arith.constant 0 : i32
    %c0_i32_0 = arith.constant 0 : i32
    %c0_i32_1 = arith.constant 0 : i32
    return %c0_i32, %c0_i32_0 : i32, i32
  }
  func.func @transform_3(%arg0: i32) -> (i32, i32) {
    %c0_i32 = arith.constant 0 : i32
    %c0_i32_0 = arith.constant 0 : i32
    return %arg0, %c0_i32 : i32, i32
  }
}

module attributes {stable_mosaic.version = 11 : i64} {
  func.func @_proj_ln_kernel(%arg0: i32, %arg1: memref<16x256xbf16, #tpu.memory_space<vmem>>, %arg2: memref<256x128xbf16, #tpu.memory_space<vmem>>, %arg3: memref<8x128xf32, #tpu.memory_space<vmem>>, %arg4: memref<16x128xbf16, #tpu.memory_space<vmem>>) attributes {dimension_semantics = [#tpu.dimension_semantics<parallel>], iteration_bounds = array<i64: 2>, scalar_prefetch = 0 : i64, scratch_operands = 0 : i64, tpu.core_type = #tpu.core_type<tc>, window_params = [{transform_indices = @transform_0, window_bounds = array<i64: 16, 256>}, {pipeline_mode = #tpu.pipeline_mode<synchronous>, transform_indices = @transform_1, window_bounds = array<i64: 256, 128>}, {pipeline_mode = #tpu.pipeline_mode<synchronous>, transform_indices = @transform_2, window_bounds = array<i64: 8, 128>}, {transform_indices = @transform_3, window_bounds = array<i64: 16, 128>}]} {
    %c0 = arith.constant 0 : index
    %c0_0 = arith.constant 0 : index
    %0 = vector.load %arg1[%c0, %c0_0] : memref<16x256xbf16, #tpu.memory_space<vmem>>, vector<16x256xbf16>
    %c0_1 = arith.constant 0 : index
    %c0_2 = arith.constant 0 : index
    %1 = vector.load %arg2[%c0_1, %c0_2] : memref<256x128xbf16, #tpu.memory_space<vmem>>, vector<256x128xbf16>
    %cst = arith.constant dense<0.000000e+00> : vector<16x128xf32>
    %2 = tpu.matmul %0, %1, %cst {dimension_numbers = #tpu.dot_dimension_numbers<[1], [0], [0], [1], [0, 0, 1, 1], [], []>} : vector<16x256xbf16>, vector<256x128xbf16>, vector<16x128xf32> -> vector<16x128xf32>
    %c0_3 = arith.constant 0 : index
    %c0_4 = arith.constant 0 : index
    %3 = vector.load %arg3[%c0_3, %c0_4] : memref<8x128xf32, #tpu.memory_space<vmem>>, vector<8x128xf32>
    %4 = vector.extract_strided_slice %3 {offsets = [0, 0], sizes = [1, 128], strides = [1, 1]} : vector<8x128xf32> to vector<1x128xf32>
    %5 = vector.broadcast %4 : vector<1x128xf32> to vector<16x128xf32>
    %6 = arith.addf %2, %5 : vector<16x128xf32>
    %cst_5 = arith.constant dense<0.000000e+00> : vector<16xf32>
    %7 = vector.multi_reduction <add>, %6, %cst_5 [1] : vector<16x128xf32> to vector<16xf32>
    %8 = vector.shape_cast %7 : vector<16xf32> to vector<16x1xf32>
    %cst_6 = arith.constant 3.125000e-02 : f32
    %9 = vector.broadcast %cst_6 : f32 to vector<16x1xf32>
    %10 = arith.mulf %8, %9 : vector<16x1xf32>
    %11 = vector.broadcast %10 : vector<16x1xf32> to vector<16x128xf32>
    %12 = arith.subf %6, %11 : vector<16x128xf32>
    %13 = tpu.iota {dimensions = array<i32: 1>} : vector<16x128xi32>
    %c32_i32 = arith.constant 32 : i32
    %14 = vector.broadcast %c32_i32 : i32 to vector<16x128xi32>
    %15 = arith.cmpi slt, %13, %14 : vector<16x128xi32>
    %cst_7 = arith.constant 0.000000e+00 : f32
    %16 = vector.broadcast %cst_7 : f32 to vector<16x128xf32>
    %17 = arith.select %15, %12, %16 : vector<16x128xi1>, vector<16x128xf32>
    %18 = arith.mulf %17, %17 : vector<16x128xf32>
    %cst_8 = arith.constant dense<0.000000e+00> : vector<16xf32>
    %19 = vector.multi_reduction <add>, %18, %cst_8 [1] : vector<16x128xf32> to vector<16xf32>
    %20 = vector.shape_cast %19 : vector<16xf32> to vector<16x1xf32>
    %cst_9 = arith.constant 3.125000e-02 : f32
    %21 = vector.broadcast %cst_9 : f32 to vector<16x1xf32>
    %22 = arith.mulf %20, %21 : vector<16x1xf32>
    %cst_10 = arith.constant 9.99999974E-6 : f32
    %23 = vector.broadcast %cst_10 : f32 to vector<16x1xf32>
    %24 = arith.addf %22, %23 : vector<16x1xf32>
    %25 = math.rsqrt %24 : vector<16x1xf32>
    %26 = vector.broadcast %25 : vector<16x1xf32> to vector<16x128xf32>
    %27 = arith.mulf %17, %26 : vector<16x128xf32>
    %28 = vector.extract_strided_slice %3 {offsets = [1, 0], sizes = [1, 128], strides = [1, 1]} : vector<8x128xf32> to vector<1x128xf32>
    %29 = vector.broadcast %28 : vector<1x128xf32> to vector<16x128xf32>
    %30 = arith.mulf %27, %29 : vector<16x128xf32>
    %31 = vector.extract_strided_slice %3 {offsets = [2, 0], sizes = [1, 128], strides = [1, 1]} : vector<8x128xf32> to vector<1x128xf32>
    %32 = vector.broadcast %31 : vector<1x128xf32> to vector<16x128xf32>
    %33 = arith.addf %30, %32 : vector<16x128xf32>
    %34 = arith.truncf %33 : vector<16x128xf32> to vector<16x128xbf16>
    %c0_11 = arith.constant 0 : index
    %c0_12 = arith.constant 0 : index
    %35 = vector.load %arg4[%c0_11, %c0_12] : memref<16x128xbf16, #tpu.memory_space<vmem>>, vector<16x128xbf16>
    tpu.vector_store %arg4[%c0_11, %c0_12], %34 {strides = array<i32>} : memref<16x128xbf16, #tpu.memory_space<vmem>>, vector<16x128xbf16>,
    return
  }
  func.func @transform_0(%arg0: i32) -> (i32, i32) {
    %c0_i32 = arith.constant 0 : i32
    %c0_i32_0 = arith.constant 0 : i32
    return %arg0, %c0_i32 : i32, i32
  }
  func.func @transform_1(%arg0: i32) -> (i32, i32) {
    %c0_i32 = arith.constant 0 : i32
    %c0_i32_0 = arith.constant 0 : i32
    %c0_i32_1 = arith.constant 0 : i32
    return %c0_i32, %c0_i32_0 : i32, i32
  }
  func.func @transform_2(%arg0: i32) -> (i32, i32) {
    %c0_i32 = arith.constant 0 : i32
    %c0_i32_0 = arith.constant 0 : i32
    %c0_i32_1 = arith.constant 0 : i32
    return %c0_i32, %c0_i32_0 : i32, i32
  }
  func.func @transform_3(%arg0: i32) -> (i32, i32) {
    %c0_i32 = arith.constant 0 : i32
    %c0_i32_0 = arith.constant 0 : i32
    return %arg0, %c0_i32 : i32, i32
  }
}

</mosaic_0001>

<bundles_post_ra>
// kernel: tpu_custom_call.1
= control target key start
LH: loop header
LB: loop body
LE: loop exit
PB: predicated region body
PF: predicated region fallthrough
CT: control target
= control target key end

     0   :  { %8 = vsyncpa [#allocation3], 0  ;;  %s1109_s0 = inlined_call_operand.hbm [shape: bf16[32,196], index: 0, kind: input, shape index: {}]   ;;  %s1110_s1 = inlined_call_operand.hbm [shape: bf16[196,128], index: 1, kind: input, shape index: {}]   ;;  %s1111_s2 = inlined_call_operand.hbm [shape: f32[8,128], index: 2, kind: input, shape index: {}]   ;;  %s1112_s3 = inlined_call_operand.hbm [shape: bf16[32,128], index: 3, kind: output, shape index: {}]  }
   0x1   :  { %10 = vsyncpa [#allocation3 + $0x1], 0 }
   0x2   :  { %11 = vsyncpa [#allocation6], 0 }
   0x3   :  { %12 = vsyncpa [#allocation4], 0 }
   0x4   :  { %14 = vsyncpa [#allocation4 + $0x1], 0  ;;  %s870_s12 = smov 0   ;;  %s872_s13 = smov 0  }
   0x5   :  { %s874_s14 = smov 0   ;;  %s876_s15 = smov 0  }
   0x6 LB: > { %s891_s16 = sadd.s32 4294967295, %s837_s15   ;;  %s540_s17 = sadd.s32 4294967294, %s837_s15   ;;  %s837_s15 = sphi %s876_s15, %s1132_s15   ;;  %s833_s14 = sphi %s874_s14, %s1131_s14   ;;  %s829_s13 = sphi %s872_s13, %s1130_s13   ;;  %s825_s12 = sphi %s870_s12, %s1129_s12  }
   0x7   : > { %p40_p0 = scmp.ne.s32.totalorder %s829_s13, %s825_s12  ;;  %p1113_p1 = scmp.eq.s32.totalorder %s891_s16, 0 }
   0x8   : > { %p112_p3 = scmp.eq.s32.totalorder %s540_s17, 1  ;;  %p541_p5 = scmp.ge.s32.totalorder %s837_s15, 1 }
   0x9   : > { %p900_p4 = por %p1113_p1, %p40_p0  ;;  %p119_p7 = scmp.lt.s32.totalorder %s837_s15, 3 }
   0xa   : > { %p905_p6 = por %p112_p3, %p40_p0  ;;  %s839_s21 = smov [#allocation5]  }
   0xb   : > { %s1116_s18 = scalar_select %p900_p4, 1, 0 }
   0xc   : > { %s1117_s19 = scalar_select %p905_p6, 1, 0 }
   0xd   : > { %p910_p8 = pnand %p541_p5, %p119_p7  ;;  %s131_s22 = sshll.u32 %s839_s21, 4  ;;  %s914_s22 = int_to_ptr.vmem [resolvable:$true] %s131_s22 }
   0xe   : > { %s840_s24 = smov [#allocation7]   ;;  %s681_s28 = scalar_lea.hbm %s1110_s1, 1600 }
   0xf   : > { %p599_p9 = pneg %p910_p8  ;;  %s145_s25 = sshll.u32 %s840_s24, 4  ;;  %s925_s25 = int_to_ptr.vmem [resolvable:$true] %s145_s25 }
  0x10   : > { %p682_p12 = scmp.ne.s32.totalorder %s1110_s1, %s681_s28  ;;  %p688_p5 = scmp.lt.u32.totalorder %s681_s28, %s1110_s1 }
  0x11   : > { %p921_p11 = pnand %p599_p9, %p1113_p1 }
  0x13   : > { %p683_p13 = pneg %p921_p11 }
  0x15   : > { %p684_p0 = pnand %p683_p13, %p682_p12 }
  0x17   : > { %p685_p3 = pneg %p684_p0 }
  0x19   : > { %p690_p7 = pnand %p688_p5, %p685_p3 }
  0x1b   : > { %693 = shalt.err (!%p690_p7)
}
  0x1c   : > { %s694_s6 = scalar_lea.vmem %s914_s22, 1600  ;;  %p702_p2 = scmp.lt.s32.totalorder %s914_s22, %s914_s22 }
  0x1d   : > { %p695_p9 = scmp.ne.s32.totalorder %s914_s22, %s694_s6  ;;  %p703_p12 = scmp.lt.s32.totalorder %s694_s6, %s694_s6 }
  0x1f   : > { %p697_p10 = pnand %p695_p9, %p683_p13  ;;  %p704_p0 = por %p703_p12, %p702_p2 }
  0x21   : > { %p698_p1 = pneg %p697_p10 }
  0x23   : > { %p705_p6 = pnand %p704_p0, %p698_p1 }
  0x25   : > { %708 = shalt.err (!%p705_p6)
}
  0x26   : > { %s841_s7 = smov 64   ;;  %s842_s8 = smov 4  }
  0x27   : > { %602 = dma.hbm_to_vmem [thread:$0]  (!%p921_p11), %s1110_s1, 1600, %s914_s22, [#allocation6], %s841_s7, %s841_s7, %s842_s8  }
  0x28   : > { %s709_s21 = scalar_lea.hbm %s1111_s2, 128 }
  0x29   : > { %p710_p2 = scmp.ne.s32.totalorder %s1111_s2, %s709_s21  ;;  %p716_p10 = scmp.lt.u32.totalorder %s709_s21, %s1111_s2 }
  0x2b   : > { %p712_p1 = pnand %p710_p2, %p683_p13 }
  0x2d   : > { %p713_p6 = pneg %p712_p1 }
  0x2f   : > { %p718_p3 = pnand %p716_p10, %p713_p6 }
  0x31   : > { %721 = shalt.err (!%p718_p3)
}
  0x32   : > { %s722_s22 = scalar_lea.vmem %s925_s25, 128  ;;  %p730_p12 = scmp.lt.s32.totalorder %s925_s25, %s925_s25 }
  0x33   : > { %p723_p5 = scmp.ne.s32.totalorder %s925_s25, %s722_s22  ;;  %p731_p0 = scmp.lt.s32.totalorder %s722_s22, %s722_s22 }
  0x35   : > { %p725_p7 = pnand %p723_p5, %p683_p13  ;;  %p732_p2 = por %p731_p0, %p730_p12 }
  0x37   : > { %p726_p9 = pneg %p725_p7 }
  0x39   : > { %p733_p1 = pnand %p732_p2, %p726_p9 }
  0x3b   : > { %736 = shalt.err (!%p733_p1)
}
  0x3c   : > { %605 = dma.hbm_to_vmem [thread:$0]  (!%p921_p11), %s1111_s2, 128, %s925_s25, [#allocation6]  }
  0x3d   : > { %s980_s4 = sadd.s32 1, %s837_s15   ;;  %s27_s23 = sadd.s32 1, %s833_s14 }
  0x3e   : > { %s24_s5 = ssub.s32 %s837_s15, %s980_s4  ;;  %p34_p13 = scmp.ne.s32.totalorder %s833_s14, %s829_s13 }
  0x3f   : > { %p25_p6 = scmp.eq.s32.totalorder %s24_s5, 0  ;;  %p35_p10 = scmp.eq.s32.totalorder %s837_s15, 0 }
  0x40   : > { %p1120_p3 = scmp.eq.s32.totalorder %s891_s16, 1  ;;  %p616_p7 = scmp.lt.s32.totalorder %s837_s15, 2 }
  0x41   : > { %s996_s7 = scalar_select %p25_p6, %s833_s14, %s27_s23  }
  0x42   : > { %p990_p5 = por %p1120_p3, %p34_p13  ;;  %p36_p9 = por %p35_p10, %p34_p13 }
  0x43   : > { %s156_s8 = sand.u32 1, %s833_s14   ;;  %s578_s25 = sshll.u32 %s837_s15, 8 }
  0x44   : > { %s1121_s6 = scalar_select %p990_p5, 1, 0 }
  0x45   : > { %s545_s9 = sshll.u32 %s156_s8, 4  ;;  %s1003_s17 = scalar_lea.hbm %s1109_s0, %s578_s25 }
  0x46   : > { %s160_s21 = scalar_lea.vmem [#allocation2], %s545_s9  ;;  %p1007_p11 = pnand %p616_p7, %p36_p9 }
  0x47   : > { %s168_s24 = sshll.u32 %s160_s21, 4  ;;  %s1011_s27 = scalar_lea.sflag [#allocation3], %s156_s8  ;;  %s1005_s24 = int_to_ptr.vmem [resolvable:$true] %s168_s24 }
  0x48   : > { %s737_s28 = scalar_lea.hbm %s1003_s17, 256  ;;  %p739_p0 = pneg %p1007_p11 }
  0x49   : > { %p738_p12 = scmp.ne.s32.totalorder %s1003_s17, %s737_s28  ;;  %s742_s30 = scalar_lea.hbm %s1109_s0, 512 }
  0x4a   : > { %p743_p13 = scmp.lt.u32.totalorder %s1003_s17, %s1109_s0  ;;  %p744_p6 = scmp.lt.u32.totalorder %s742_s30, %s737_s28 }
  0x4b   : > { %p740_p2 = pnand %p739_p0, %p738_p12  ;;  %p746_p3 = scmp.lt.u32.totalorder %s737_s28, %s1003_s17 }
  0x4c   : > { %p745_p10 = por %p744_p6, %p743_p13 }
  0x4d   : > { %p741_p1 = pneg %p740_p2 }
  0x4e   : > { %p747_p7 = por %p746_p3, %p745_p10 }
  0x50   : > { %p748_p9 = pnand %p747_p7, %p741_p1 }
  0x52   : > { %751 = shalt.err (!%p748_p9)
}
  0x53   : > { %s752_s8 = scalar_lea.vmem %s1005_s24, 256  ;;  %s843_s9 = smov [#allocation2]  }
  0x54   : > { %p753_p12 = scmp.ne.s32.totalorder %s1005_s24, %s752_s8  ;;  %s757_s25 = sshll.u32 %s843_s9, 4  ;;  %s758_s25 = int_to_ptr.vmem [resolvable:$false] %s757_s25 }
  0x55   : > { %s759_s10 = scalar_lea.vmem %s758_s25, 512  ;;  %p760_p4 = scmp.lt.s32.totalorder %s1005_s24, %s758_s25 }
  0x56   : > { %p755_p2 = pnand %p753_p12, %p739_p0  ;;  %p761_p13 = scmp.lt.s32.totalorder %s759_s10, %s752_s8 }
  0x58   : > { %p756_p5 = pneg %p755_p2  ;;  %p762_p6 = por %p761_p13, %p760_p4 }
  0x5a   : > { %p763_p10 = pnand %p762_p6, %p756_p5 }
  0x5c   : > { %766 = shalt.err (!%p763_p10)
}
  0x5d   : > { %s844_s11 = smov 128   ;;  %s845_s21 = smov 8  }
  0x5e   : > { %609 = dma.hbm_to_vmem [thread:$0]  (!%p1007_p11), %s1003_s17, 256, %s1005_s24, %s1011_s27, %s844_s11, %s844_s11, %s845_s21  }
  0x5f   : > { %180 = sbr.rel (%p910_p8) target bundleno = 706 (0x2c2), region = 32  ;;  %s1042_s28 = sand.u32 (!%p910_p8), 1, %s829_s13  }
  0x60   : > { %s550_s22 = sshll.u32 (!%p910_p8), %s1042_s28, 4  ;;  %s183_s29 = scalar_lea.sflag (!%p910_p8), [#allocation3], %s1042_s28 }
  0x61   : > { %s1046_s30 = scalar_lea.vmem (!%p910_p8), [#allocation2], %s550_s22  ;;  %p1123_p4 = scmp.ne.s32.totalorder (!%p910_p8), %s1116_s18, 0 }
  0x66   : > { %812 = dma.done.wait (%p1123_p4), %s183_s29, 256  }
  0x67   : > { %814 = vsyncadd (%p1123_p4), %s183_s29, 4294967040  ;;  %p1124_p5 = scmp.eq.s32.totalorder %s891_s16, 0 }
  0x69   : > { %816 = dma.done.wait (%p1124_p5), [#allocation6], 1728   ;;  %p1125_p8 = pmov %p1124_p5 }
  0x6a   : > { %v846_v0 = vmov 0   ;;  %v661_v1 = vld [vmem:[#allocation5] sm:$0xff]   ;;  %v662_v2 = vld [vmem:[#allocation5 + $0x8] sm:$0xff]   ;;  %v663_v3 = vld [vmem:[#allocation5 + $0x10] sm:$0xff]   ;;  %vm336_vm0 = vcmask 556032   ;;  %vm340_vm1 = vcmask 1041408   ;;  %v248_v17 = vlaneseq }
  0x6b   : > { %818 = vsyncadd (%p1125_p8), [#allocation6], 4294965568  ;;  %344 = vmatprep.subr.bf16.mxu0 %v846_v0  ;;  %v664_v4 = vld [vmem:[#allocation5 + $0x18] sm:$0xff]   ;;  %v665_v6 = vld [vmem:[#allocation5 + $0x20] sm:$0xff]   ;;  %s553_s18 = sshll.u32 %s1042_s28, 3  ;;  %s581_s20 = sshll.u32 %s891_s16, 7 }
  0x6c   : > { %345 = vmatpush1.bf16.msra.mxu0 %v661_v1  ;;  %v676_v5 = vld [vmem:[%s1046_s30 + $0x4] ss:$8 sps:$4 sm:$0xff]   ;;  %v673_v14 = vld [vmem:[#allocation5 + $0x60] ss:$0 sps:$4 sm:$0x33]   ;;  %v249_v18 = vshrl.u32 %v248_v17, 7  ;;  %s1063_s23 = scalar_lea.hbm %s1112_s3, %s581_s20 }
  0x6d   : > { %346 = vmatprep.subr.bf16.mxu0 %v846_v0  ;;  %569 = vmatprep.mubr.msk.bf16.mxu0 %vm336_vm0, %v676_v5  ;;  %v666_v7 = vld [vmem:[#allocation5 + $0x28] sm:$0xff]   ;;  %v667_v8 = vld [vmem:[#allocation5 + $0x30] sm:$0xff]   ;;  %v668_v9 = vld [vmem:[#allocation5 + $0x38] sm:$0xff]   ;;  %v342_v15 = vsel %vm340_vm1, %v673_v14, 0  ;;  %v394_v28 = vand.u32 127, %v248_v17  ;;  %s216_s17 = scalar_lea.vmem [#allocation8], %s553_s18 }
  0x6e   : > { %v669_v10 = vld [vmem:[#allocation5 + $0x40] sm:$0xff]   ;;  %v670_v11 = vld [vmem:[#allocation5 + $0x48] sm:$0xff]   ;;  %v671_v12 = vld [vmem:[#allocation5 + $0x50] sm:$0xff]   ;;  %v250_v19 = vsub.s32 0, %v249_v18  ;;  %v414_v45 = vsub.s32 1, %v249_v18  ;;  %v420_v48 = vsub.s32 2, %v249_v18 }
  0x6f   : > { %v672_v13 = vld [vmem:[#allocation5 + $0x58] sm:$0xff]   ;;  %v247_v20 = vld [vmem:[#allocation7] sm:$0xff]  ;;  %vm395_vm2 = vcmp.lt.s32.totalorder %v394_v28, 32  ;;  %s448_s24 = sshll.u32 %s216_s17, 4  ;;  %s435_s5 = scalar_lea.sflag [#allocation4], %s1042_s28  ;;  %s1065_s24 = int_to_ptr.vmem [resolvable:$true] %s448_s24 }
  0x70   : > { %347 = vmatpush1.bf16.msra.mxu0 %v662_v2  ;;  %v674_v16 = vld [vmem:[%s1046_s30] ss:$8 sps:$4 sm:$0xff]   ;;  %v251_v21 = vrot.slane %v247_v20, %v250_v19  ;;  %v415_v47 = vrot.slane %v247_v20, %v414_v45  ;;  %v421_v51 = vrot.slane %v247_v20, %v420_v48  ;;  %s767_s8 = scalar_lea.vmem %s1065_s24, 128  ;;  %p1126_p0 = scmp.ne.s32.totalorder %s1121_s6, 0 }
  0x71   : > { %348 = vmatprep.subr.bf16.mxu0 %v846_v0  ;;  %p768_p11 = scmp.ne.s32.totalorder %s1065_s24, %s767_s8  ;;  %s847_s16 = smov [#allocation8]  }
  0x72   : > { %s771_s9 = sshll.u32 %s847_s16, 4  ;;  %s772_s9 = int_to_ptr.vmem [resolvable:$false] %s771_s9 }
  0x73   : > { %p769_p1 = pnand %p768_p11, %p1126_p0  ;;  %s773_s25 = scalar_lea.vmem %s772_s9, 256 }
  0x74   : > { %349 = vmatpush1.bf16.msra.mxu0 %v663_v3  ;;  %p774_p7 = scmp.lt.s32.totalorder %s1065_s24, %s772_s9  ;;  %p775_p9 = scmp.lt.s32.totalorder %s773_s25, %s767_s8 }
  0x75   : > { %350 = vmatprep.subr.bf16.mxu0 %v846_v0  ;;  %p770_p3 = pneg %p769_p1 }
  0x76   : > { %p776_p12 = por %p775_p9, %p774_p7 }
  0x78   : > { %351 = vmatpush1.bf16.msra.mxu0 %v664_v4  ;;  %p777_p2 = pnand %p776_p12, %p770_p3 }
  0x79   : > { %352 = vmatprep.subr.bf16.mxu0 %v846_v0 }
  0x7c   : > { %353 = vmatpush1.bf16.msra.mxu0 %v665_v6 }
  0x7d   : > { %354 = vmatprep.subr.bf16.mxu0 %v846_v0 }
  0x80   : > { %355 = vmatpush1.bf16.msra.mxu0 %v666_v7 }
  0x81   : > { %356 = vmatprep.subr.bf16.mxu0 %v846_v0 }
  0x84   : > { %357 = vmatpush1.bf16.msra.mxu0 %v667_v8 }
  0x85   : > { %358 = vmatprep.subr.bf16.mxu0 %v846_v0 }
  0x88   : > { %359 = vmatpush1.bf16.msra.mxu0 %v668_v9 }
  0x89   : > { %360 = vmatprep.subr.bf16.mxu0 %v846_v0 }
  0x8c   : > { %361 = vmatpush1.bf16.msra.mxu0 %v669_v10 }
  0x8d   : > { %362 = vmatprep.subr.bf16.mxu0 %v846_v0 }
  0x90   : > { %363 = vmatpush1.bf16.msra.mxu0 %v670_v11 }
  0x91   : > { %364 = vmatprep.subr.bf16.mxu0 %v846_v0 }
  0x94   : > { %365 = vmatpush1.bf16.msra.mxu0 %v671_v12 }
  0x95   : > { %366 = vmatprep.subr.bf16.mxu0 %v846_v0 }
  0x98   : > { %367 = vmatpush1.bf16.msra.mxu0 %v672_v13 }
  0x99   : > { %368 = vmatprep.subr.bf16.mxu0 %v846_v0 }
  0x9c   : > { %369 = vmatpush1.bf16.msra.mxu0 %v342_v15 }
  0x9f   : > { %377 = vmatmul.mubr.bf16.vlgmr.msra.gmra.mrb[0].mxu0 %v674_v16 }
 0x172   : > { %v378_v22 = vpop.f32.mrb[0].mxu0 }
 0x173   : > { %v379_v23 = vadd.f32 %v378_v22, %v251_v21  ;;  %v380_v24 = vpop.f32.mrb[1].mxu0 }
 0x174   : > { %v381_v25 = vpop.f32.mrb[2].mxu0 }
 0x175   : > { %v383_v26 = vpop.f32.mrb[3].mxu0  ;;  %385 = vadd.xlane.f32.xlu0 %v379_v23  ;;  %v382_v27 = vadd.f32 %v381_v25, %v251_v21 }
 0x179   : > { %387 = vadd.xlane.f32.xlu0 %v382_v27 }
 0x202   : > { %v386_v29 = vpop.xlane.xlu0 %385 }
 0x203   : > { %v389_v30 = vmul.f32 0.03125, %v386_v29 }
 0x205   : > { %v391_v31 = vsub.f32 %v379_v23, %v389_v30 }
 0x206   : > { %v388_v32 = vpop.xlane.xlu0 %387 }
 0x207   : > { %v390_v33 = vmul.f32 0.03125, %v388_v32  ;;  %v396_v34 = vsel %vm395_vm2, %v391_v31, 0.0 }
 0x208   : > { %v398_v35 = vmul.f32 %v396_v34, %v396_v34 }
 0x209   : > { %v392_v36 = vsub.f32 %v382_v27, %v390_v33 }
 0x20a   : > { %400 = vadd.xlane.f32.xlu1 %v398_v35 }
 0x20b   : > { %v397_v37 = vsel %vm395_vm2, %v392_v36, 0.0 }
 0x20c   : > { %v399_v38 = vmul.f32 %v397_v37, %v397_v37 }
 0x20e   : > { %402 = vadd.xlane.f32.xlu1 %v399_v38 }
 0x297   : > { %v401_v39 = vpop.xlane.xlu1 %400 }
 0x298   : > { %v404_v40 = vmul.f32 0.03125, %v401_v39 }
 0x29a   : > { %v406_v41 = vadd.f32 1e-05, %v404_v40 }
 0x29b   : > { %v403_v42 = vpop.xlane.xlu1 %402 }
 0x29c   : > { %677 = vrsqrt.f32 %v406_v41  ;;  %v405_v43 = vmul.f32 0.03125, %v403_v42 }
 0x29e   : > { %v407_v44 = vadd.f32 1e-05, %v405_v43 }
 0x2a0   : > { %679 = vrsqrt.f32 %v407_v44 }
 0x2a6   : > { %v678_v46 = vpop.eup %677 }
 0x2a7   : > { %v410_v49 = vmul.f32 %v678_v46, %v396_v34 }
 0x2a9   : > { %v416_v52 = vmul.f32 %v415_v47, %v410_v49 }
 0x2aa   : > { %v680_v50 = vpop.eup %679 }
 0x2ab   : > { %v411_v53 = vmul.f32 %v680_v50, %v397_v37  ;;  %v422_v55 = vadd.f32 %v421_v51, %v416_v52 }
 0x2ad   : > { %v417_v54 = vmul.f32 %v415_v47, %v411_v53 }
 0x2af   : > { %v423_v56 = vadd.f32 %v421_v51, %v417_v54 }
 0x2b1   : > { %v585_v57 = vpack.c.bf16 %v423_v56, %v422_v55 }
 0x2b3   : > { %586 = vst [vmem:[%s216_s17] sm:$0xff] %v585_v57  }
 0x2b4   : > { %780 = shalt.err (!%p777_p2)
}
 0x2b5   : > { %s781_s10 = scalar_lea.hbm %s1063_s23, 128  ;;  %s785_s22 = scalar_lea.hbm %s1112_s3, 256 }
 0x2b6   : > { %p782_p13 = scmp.ne.s32.totalorder %s1063_s23, %s781_s10  ;;  %p786_p4 = scmp.lt.u32.totalorder %s1063_s23, %s1112_s3 }
 0x2b7   : > { %p787_p5 = scmp.lt.u32.totalorder %s785_s22, %s781_s10  ;;  %p789_p11 = scmp.lt.u32.totalorder %s781_s10, %s1063_s23 }
 0x2b8   : > { %p783_p6 = pnand %p782_p13, %p1126_p0 }
 0x2b9   : > { %p788_p8 = por %p787_p5, %p786_p4 }
 0x2ba   : > { %p784_p10 = pneg %p783_p6 }
 0x2bb   : > { %p790_p1 = por %p789_p11, %p788_p8 }
 0x2bd   : > { %p791_p3 = pnand %p790_p1, %p784_p10 }
 0x2bf   : > { %794 = shalt.err (!%p791_p3)
}
 0x2c0   : > { %s848_s18 = smov 64   ;;  %s849_s20 = smov 4  }
 0x2c1   : > { %597 = dma.vmem_to_hbm [thread:$0]  (%p1126_p0), %s1065_s24, 128, %s1063_s23, %s435_s5, %s848_s18, %s848_s18, %s849_s20  }
 0x2c2 PF: > { %s463_s17 = sand.u32 1, %s825_s12   ;;  %p1127_p7 = scmp.ne.s32.totalorder %s1117_s19, 0 }
 0x2c3   : > { %p1128_p9 = scmp.ge.s32.totalorder %s837_s15, 2  ;;  %s464_s26 = scalar_lea.sflag [#allocation4], %s463_s17 }
 0x2c5   : > { %p611_p12 = pnand %p1128_p9, %p1127_p7 }
 0x2c7   : > { %820 = dma.done.wait (!%p611_p12), %s464_s26, 128  }
 0x2c8   : > { %822 = vsyncadd (!%p611_p12), %s464_s26, 4294967168  ;;  %p17_p2 = scmp.ge.s32.totalorder %s980_s4, 4   ;;  %s1129_s12 = smov %s829_s13 }
 0x2c9   : > { %s1130_s13 = smov %s833_s14  ;;  %s1131_s14 = smov %s996_s7 }
 0x2ca   : > { %s1132_s15 = smov %s980_s4  ;;  %19 = sbr.rel (!%p17_p2) target bundleno = 6 (0x6), region = 85 }
 0x2d1   :  { %469 = vsyncpa [#allocation3], 1 }
 0x2d2   :  { %471 = vsyncpa [#allocation3 + $0x1], 1 }
 0x2d3   :  { %472 = vsyncpa [#allocation6], 1 }
 0x2d4   :  { %473 = vsyncpa [#allocation4], 1 }
 0x2d5   :  { %475 = vsyncpa [#allocation4 + $0x1], 1 }

// kernel: tpu_custom_call.1
= control target key start
LH: loop header
LB: loop body
LE: loop exit
PB: predicated region body
PF: predicated region fallthrough
CT: control target
= control target key end

     0   :  { %8 = vsyncpa [#allocation3], 0  ;;  %s1155_s0 = inlined_call_operand.hbm [shape: bf16[32,256], index: 0, kind: input, shape index: {}]   ;;  %s1156_s1 = inlined_call_operand.hbm [shape: bf16[256,128], index: 1, kind: input, shape index: {}]   ;;  %s1157_s2 = inlined_call_operand.hbm [shape: f32[8,128], index: 2, kind: input, shape index: {}]   ;;  %s1158_s3 = inlined_call_operand.hbm [shape: bf16[32,128], index: 3, kind: output, shape index: {}]  }
   0x1   :  { %10 = vsyncpa [#allocation3 + $0x1], 0 }
   0x2   :  { %11 = vsyncpa [#allocation6], 0 }
   0x3   :  { %12 = vsyncpa [#allocation4], 0 }
   0x4   :  { %14 = vsyncpa [#allocation4 + $0x1], 0  ;;  %s916_s12 = smov 0   ;;  %s918_s13 = smov 0  }
   0x5   :  { %s920_s14 = smov 0   ;;  %s922_s15 = smov 0  }
   0x6 LB: > { %s937_s16 = sadd.s32 4294967295, %s884_s15   ;;  %s561_s17 = sadd.s32 4294967294, %s884_s15   ;;  %s884_s15 = sphi %s922_s15, %s1178_s15   ;;  %s880_s14 = sphi %s920_s14, %s1177_s14   ;;  %s876_s13 = sphi %s918_s13, %s1176_s13   ;;  %s872_s12 = sphi %s916_s12, %s1175_s12  }
   0x7   : > { %p40_p0 = scmp.ne.s32.totalorder %s876_s13, %s872_s12  ;;  %p1159_p1 = scmp.eq.s32.totalorder %s937_s16, 0 }
   0x8   : > { %p112_p3 = scmp.eq.s32.totalorder %s561_s17, 1  ;;  %p562_p5 = scmp.ge.s32.totalorder %s884_s15, 1 }
   0x9   : > { %p946_p4 = por %p1159_p1, %p40_p0  ;;  %p119_p7 = scmp.lt.s32.totalorder %s884_s15, 3 }
   0xa   : > { %p951_p6 = por %p112_p3, %p40_p0  ;;  %s886_s21 = smov [#allocation5]  }
   0xb   : > { %s1162_s18 = scalar_select %p946_p4, 1, 0 }
   0xc   : > { %s1163_s19 = scalar_select %p951_p6, 1, 0 }
   0xd   : > { %p956_p8 = pnand %p562_p5, %p119_p7  ;;  %s131_s22 = sshll.u32 %s886_s21, 4  ;;  %s960_s22 = int_to_ptr.vmem [resolvable:$true] %s131_s22 }
   0xe   : > { %s887_s24 = smov [#allocation7]   ;;  %s728_s28 = scalar_lea.hbm %s1156_s1, 2048 }
   0xf   : > { %p644_p9 = pneg %p956_p8  ;;  %s145_s25 = sshll.u32 %s887_s24, 4  ;;  %s971_s25 = int_to_ptr.vmem [resolvable:$true] %s145_s25 }
  0x10   : > { %p729_p12 = scmp.ne.s32.totalorder %s1156_s1, %s728_s28  ;;  %p735_p5 = scmp.lt.u32.totalorder %s728_s28, %s1156_s1 }
  0x11   : > { %p967_p11 = pnand %p644_p9, %p1159_p1 }
  0x13   : > { %p730_p13 = pneg %p967_p11 }
  0x15   : > { %p731_p0 = pnand %p730_p13, %p729_p12 }
  0x17   : > { %p732_p3 = pneg %p731_p0 }
  0x19   : > { %p737_p7 = pnand %p735_p5, %p732_p3 }
  0x1b   : > { %740 = shalt.err (!%p737_p7)
}
  0x1c   : > { %s741_s6 = scalar_lea.vmem %s960_s22, 2048  ;;  %p749_p2 = scmp.lt.s32.totalorder %s960_s22, %s960_s22 }
  0x1d   : > { %p742_p9 = scmp.ne.s32.totalorder %s960_s22, %s741_s6  ;;  %p750_p12 = scmp.lt.s32.totalorder %s741_s6, %s741_s6 }
  0x1f   : > { %p744_p10 = pnand %p742_p9, %p730_p13  ;;  %p751_p0 = por %p750_p12, %p749_p2 }
  0x21   : > { %p745_p1 = pneg %p744_p10 }
  0x23   : > { %p752_p6 = pnand %p751_p0, %p745_p1 }
  0x25   : > { %755 = shalt.err (!%p752_p6)
}
  0x26   : > { %s888_s7 = smov 64   ;;  %s889_s8 = smov 4  }
  0x27   : > { %647 = dma.hbm_to_vmem [thread:$0]  (!%p967_p11), %s1156_s1, 2048, %s960_s22, [#allocation6], %s888_s7, %s888_s7, %s889_s8  }
  0x28   : > { %s756_s21 = scalar_lea.hbm %s1157_s2, 128 }
  0x29   : > { %p757_p2 = scmp.ne.s32.totalorder %s1157_s2, %s756_s21  ;;  %p763_p10 = scmp.lt.u32.totalorder %s756_s21, %s1157_s2 }
  0x2b   : > { %p759_p1 = pnand %p757_p2, %p730_p13 }
  0x2d   : > { %p760_p6 = pneg %p759_p1 }
  0x2f   : > { %p765_p3 = pnand %p763_p10, %p760_p6 }
  0x31   : > { %768 = shalt.err (!%p765_p3)
}
  0x32   : > { %s769_s22 = scalar_lea.vmem %s971_s25, 128  ;;  %p777_p12 = scmp.lt.s32.totalorder %s971_s25, %s971_s25 }
  0x33   : > { %p770_p5 = scmp.ne.s32.totalorder %s971_s25, %s769_s22  ;;  %p778_p0 = scmp.lt.s32.totalorder %s769_s22, %s769_s22 }
  0x35   : > { %p772_p7 = pnand %p770_p5, %p730_p13  ;;  %p779_p2 = por %p778_p0, %p777_p12 }
  0x37   : > { %p773_p9 = pneg %p772_p7 }
  0x39   : > { %p780_p1 = pnand %p779_p2, %p773_p9 }
  0x3b   : > { %783 = shalt.err (!%p780_p1)
}
  0x3c   : > { %650 = dma.hbm_to_vmem [thread:$0]  (!%p967_p11), %s1157_s2, 128, %s971_s25, [#allocation6]  }
  0x3d   : > { %s1026_s4 = sadd.s32 1, %s884_s15   ;;  %s27_s23 = sadd.s32 1, %s880_s14 }
  0x3e   : > { %s24_s5 = ssub.s32 %s884_s15, %s1026_s4  ;;  %p34_p13 = scmp.ne.s32.totalorder %s880_s14, %s876_s13 }
  0x3f   : > { %p25_p6 = scmp.eq.s32.totalorder %s24_s5, 0  ;;  %p35_p10 = scmp.eq.s32.totalorder %s884_s15, 0 }
  0x40   : > { %p1166_p3 = scmp.eq.s32.totalorder %s937_s16, 1  ;;  %p661_p7 = scmp.lt.s32.totalorder %s884_s15, 2 }
  0x41   : > { %s1042_s7 = scalar_select %p25_p6, %s880_s14, %s27_s23  }
  0x42   : > { %p1036_p5 = por %p1166_p3, %p34_p13  ;;  %p36_p9 = por %p35_p10, %p34_p13 }
  0x43   : > { %s156_s8 = sand.u32 1, %s880_s14   ;;  %s601_s25 = sshll.u32 %s884_s15, 8 }
  0x44   : > { %s1167_s6 = scalar_select %p1036_p5, 1, 0 }
  0x45   : > { %s566_s9 = sshll.u32 %s156_s8, 4  ;;  %s1049_s17 = scalar_lea.hbm %s1155_s0, %s601_s25 }
  0x46   : > { %s160_s21 = scalar_lea.vmem [#allocation2], %s566_s9  ;;  %p1053_p11 = pnand %p661_p7, %p36_p9 }
  0x47   : > { %s168_s24 = sshll.u32 %s160_s21, 4  ;;  %s1057_s27 = scalar_lea.sflag [#allocation3], %s156_s8  ;;  %s1051_s24 = int_to_ptr.vmem [resolvable:$true] %s168_s24 }
  0x48   : > { %s784_s28 = scalar_lea.hbm %s1049_s17, 256  ;;  %p786_p0 = pneg %p1053_p11 }
  0x49   : > { %p785_p12 = scmp.ne.s32.totalorder %s1049_s17, %s784_s28  ;;  %s789_s30 = scalar_lea.hbm %s1155_s0, 512 }
  0x4a   : > { %p790_p13 = scmp.lt.u32.totalorder %s1049_s17, %s1155_s0  ;;  %p791_p6 = scmp.lt.u32.totalorder %s789_s30, %s784_s28 }
  0x4b   : > { %p787_p2 = pnand %p786_p0, %p785_p12  ;;  %p793_p3 = scmp.lt.u32.totalorder %s784_s28, %s1049_s17 }
  0x4c   : > { %p792_p10 = por %p791_p6, %p790_p13 }
  0x4d   : > { %p788_p1 = pneg %p787_p2 }
  0x4e   : > { %p794_p7 = por %p793_p3, %p792_p10 }
  0x50   : > { %p795_p9 = pnand %p794_p7, %p788_p1 }
  0x52   : > { %798 = shalt.err (!%p795_p9)
}
  0x53   : > { %s799_s8 = scalar_lea.vmem %s1051_s24, 256  ;;  %s890_s9 = smov [#allocation2]  }
  0x54   : > { %p800_p12 = scmp.ne.s32.totalorder %s1051_s24, %s799_s8  ;;  %s804_s25 = sshll.u32 %s890_s9, 4  ;;  %s805_s25 = int_to_ptr.vmem [resolvable:$false] %s804_s25 }
  0x55   : > { %s806_s10 = scalar_lea.vmem %s805_s25, 512  ;;  %p807_p4 = scmp.lt.s32.totalorder %s1051_s24, %s805_s25 }
  0x56   : > { %p802_p2 = pnand %p800_p12, %p786_p0  ;;  %p808_p13 = scmp.lt.s32.totalorder %s806_s10, %s799_s8 }
  0x58   : > { %p803_p5 = pneg %p802_p2  ;;  %p809_p6 = por %p808_p13, %p807_p4 }
  0x5a   : > { %p810_p10 = pnand %p809_p6, %p803_p5 }
  0x5c   : > { %813 = shalt.err (!%p810_p10)
}
  0x5d   : > { %s891_s11 = smov 128   ;;  %s892_s21 = smov 8  }
  0x5e   : > { %654 = dma.hbm_to_vmem [thread:$0]  (!%p1053_p11), %s1049_s17, 256, %s1051_s24, %s1057_s27, %s891_s11, %s891_s11, %s892_s21  }
  0x5f   : > { %180 = sbr.rel (%p956_p8) target bundleno = 689 (0x2b1), region = 32  ;;  %s1088_s28 = sand.u32 (!%p956_p8), 1, %s876_s13  }
  0x60   : > { %s571_s22 = sshll.u32 (!%p956_p8), %s1088_s28, 4  ;;  %s183_s29 = scalar_lea.sflag (!%p956_p8), [#allocation3], %s1088_s28 }
  0x61   : > { %s1092_s30 = scalar_lea.vmem (!%p956_p8), [#allocation2], %s571_s22  ;;  %p1169_p4 = scmp.ne.s32.totalorder (!%p956_p8), %s1162_s18, 0 }
  0x66   : > { %859 = dma.done.wait (%p1169_p4), %s183_s29, 256  }
  0x67   : > { %861 = vsyncadd (%p1169_p4), %s183_s29, 4294967040  ;;  %p1170_p5 = scmp.eq.s32.totalorder %s937_s16, 0 }
  0x69   : > { %863 = dma.done.wait (%p1170_p5), [#allocation6], 2176   ;;  %p1171_p8 = pmov %p1170_p5 }
  0x6a   : > { %v705_v0 = vld [vmem:[#allocation5 + $0x40] sm:$0xff]   ;;  %v707_v2 = vld [vmem:[#allocation5 + $0x48] sm:$0xff]   ;;  %v709_v4 = vld [vmem:[#allocation5 + $0x50] sm:$0xff]   ;;  %v255_v18 = vlaneseq  ;;  %s574_s18 = sshll.u32 %s1088_s28, 3  ;;  %s604_s20 = sshll.u32 %s937_s16, 7 }
  0x6b   : > { %865 = vsyncadd (%p1171_p8), [#allocation6], 4294965120  ;;  %v706_v1 = vld [vmem:[#allocation5] sm:$0xff]   ;;  %610 = vmatprep.subr.bf16.mxu0 %v705_v0  ;;  %v708_v3 = vld [vmem:[#allocation5 + $0x8] sm:$0xff]   ;;  %s216_s17 = scalar_lea.vmem [#allocation8], %s574_s18  ;;  %s1109_s23 = scalar_lea.hbm %s1158_s3, %s604_s20 }
  0x6c   : > { %611 = vmatpush3.bf16.msra.mxu0 %v706_v1  ;;  %v710_v5 = vld [vmem:[#allocation5 + $0x10] sm:$0xff]   ;;  %v711_v6 = vld [vmem:[#allocation5 + $0x58] sm:$0xff]   ;;  %v713_v8 = vld [vmem:[#allocation5 + $0x60] sm:$0xff]   ;;  %v256_v19 = vshrl.u32 %v255_v18, 7  ;;  %v415_v35 = vand.u32 127, %v255_v18  ;;  %s469_s24 = sshll.u32 %s216_s17, 4  ;;  %s1111_s24 = int_to_ptr.vmem [resolvable:$true] %s469_s24 }
  0x6d   : > { %612 = vmatprep.subr.bf16.mxu0 %v707_v2  ;;  %v712_v7 = vld [vmem:[#allocation5 + $0x18] sm:$0xff]   ;;  %v714_v9 = vld [vmem:[#allocation5 + $0x20] sm:$0xff]   ;;  %v715_v10 = vld [vmem:[#allocation5 + $0x68] sm:$0xff]   ;;  %s456_s5 = scalar_lea.sflag [#allocation4], %s1088_s28  ;;  %s814_s8 = scalar_lea.vmem %s1111_s24, 128 }
  0x6e   : > { %v723_v11 = vld [vmem:[%s1092_s30 + $0x4] ss:$8 sps:$4 sm:$0xff]   ;;  %v721_v17 = vld [vmem:[%s1092_s30] ss:$8 sps:$4 sm:$0xff]   ;;  %v435_v20 = vsub.s32 1, %v256_v19  ;;  %v441_v21 = vsub.s32 2, %v256_v19  ;;  %p815_p11 = scmp.ne.s32.totalorder %s1111_s24, %s814_s8 }
  0x6f   : > { %v716_v12 = vld [vmem:[#allocation5 + $0x28] sm:$0xff]   ;;  %397 = vmatprep.mubr.bf16.mxu0 %v723_v11  ;;  %v717_v13 = vld [vmem:[#allocation5 + $0x70] sm:$0xff]   ;;  %v719_v15 = vld [vmem:[#allocation5 + $0x78] sm:$0xff]   ;;  %v257_v25 = vsub.s32 0, %v256_v19  ;;  %vm416_vm0 = vcmp.lt.s32.totalorder %v415_v35, 32  ;;  %p1172_p0 = scmp.ne.s32.totalorder %s1167_s6, 0 }
  0x70   : > { %613 = vmatpush3.bf16.msra.mxu0 %v708_v3  ;;  %v718_v14 = vld [vmem:[#allocation5 + $0x30] sm:$0xff]   ;;  %v720_v16 = vld [vmem:[#allocation5 + $0x38] sm:$0xff]   ;;  %v254_v22 = vld [vmem:[#allocation7] sm:$0xff]  ;;  %s893_s16 = smov [#allocation8]  }
  0x71   : > { %614 = vmatprep.subr.bf16.mxu0 %v709_v4  ;;  %v436_v23 = vrot.slane %v254_v22, %v435_v20  ;;  %v442_v24 = vrot.slane %v254_v22, %v441_v21  ;;  %v258_v27 = vrot.slane %v254_v22, %v257_v25  ;;  %p816_p1 = pnand %p815_p11, %p1172_p0  ;;  %s818_s9 = sshll.u32 %s893_s16, 4  ;;  %s819_s9 = int_to_ptr.vmem [resolvable:$false] %s818_s9 }
  0x72   : > { %s820_s25 = scalar_lea.vmem %s819_s9, 256  ;;  %p821_p7 = scmp.lt.s32.totalorder %s1111_s24, %s819_s9 }
  0x73   : > { %p817_p3 = pneg %p816_p1  ;;  %p822_p9 = scmp.lt.s32.totalorder %s820_s25, %s814_s8 }
  0x74   : > { %615 = vmatpush3.bf16.msra.mxu0 %v710_v5 }
  0x75   : > { %616 = vmatprep.subr.bf16.mxu0 %v711_v6  ;;  %p823_p12 = por %p822_p9, %p821_p7 }
  0x77   : > { %p824_p2 = pnand %p823_p12, %p817_p3 }
  0x78   : > { %617 = vmatpush3.bf16.msra.mxu0 %v712_v7 }
  0x79   : > { %618 = vmatprep.subr.bf16.mxu0 %v713_v8 }
  0x7c   : > { %619 = vmatpush3.bf16.msra.mxu0 %v714_v9 }
  0x7d   : > { %620 = vmatprep.subr.bf16.mxu0 %v715_v10 }
  0x80   : > { %621 = vmatpush3.bf16.msra.mxu0 %v716_v12 }
  0x81   : > { %622 = vmatprep.subr.bf16.mxu0 %v717_v13 }
  0x84   : > { %623 = vmatpush3.bf16.msra.mxu0 %v718_v14 }
  0x85   : > { %624 = vmatprep.subr.bf16.mxu0 %v719_v15 }
  0x88   : > { %625 = vmatpush3.bf16.msra.mxu0 %v720_v16 }
  0x8b   : > { %398 = vmatmul.mubr.bf16.vlgmr.msra.gmra.mrb[0].mxu0 %v721_v17 }
 0x15e   : > { %v626_v26 = vpop.f32.mrb[0].mxu0 }
 0x15f   : > { %v627_v28 = vpop.f32.mrb[1].mxu0 }
 0x160   : > { %v628_v29 = vadd.f32 %v627_v28, %v626_v26  ;;  %v629_v30 = vpop.f32.mrb[2].mxu0 }
 0x161   : > { %v630_v31 = vpop.f32.mrb[3].mxu0 }
 0x162   : > { %v631_v32 = vadd.f32 %v630_v31, %v629_v30  ;;  %v400_v33 = vadd.f32 %v628_v29, %v258_v27 }
 0x164   : > { %406 = vadd.xlane.f32.xlu0 %v400_v33  ;;  %v403_v34 = vadd.f32 %v631_v32, %v258_v27 }
 0x168   : > { %408 = vadd.xlane.f32.xlu0 %v403_v34 }
 0x1f1   : > { %v407_v36 = vpop.xlane.xlu0 %406 }
 0x1f2   : > { %v410_v37 = vmul.f32 0.03125, %v407_v36 }
 0x1f4   : > { %v412_v38 = vsub.f32 %v400_v33, %v410_v37 }
 0x1f5   : > { %v409_v39 = vpop.xlane.xlu0 %408 }
 0x1f6   : > { %v411_v40 = vmul.f32 0.03125, %v409_v39  ;;  %v417_v41 = vsel %vm416_vm0, %v412_v38, 0.0 }
 0x1f7   : > { %v419_v42 = vmul.f32 %v417_v41, %v417_v41 }
 0x1f8   : > { %v413_v43 = vsub.f32 %v403_v34, %v411_v40 }
 0x1f9   : > { %421 = vadd.xlane.f32.xlu1 %v419_v42 }
 0x1fa   : > { %v418_v44 = vsel %vm416_vm0, %v413_v43, 0.0 }
 0x1fb   : > { %v420_v45 = vmul.f32 %v418_v44, %v418_v44 }
 0x1fd   : > { %423 = vadd.xlane.f32.xlu1 %v420_v45 }
 0x286   : > { %v422_v46 = vpop.xlane.xlu1 %421 }
 0x287   : > { %v425_v47 = vmul.f32 0.03125, %v422_v46 }
 0x289   : > { %v427_v48 = vadd.f32 1e-05, %v425_v47 }
 0x28a   : > { %v424_v49 = vpop.xlane.xlu1 %423 }
 0x28b   : > { %724 = vrsqrt.f32 %v427_v48  ;;  %v426_v50 = vmul.f32 0.03125, %v424_v49 }
 0x28d   : > { %v428_v51 = vadd.f32 1e-05, %v426_v50 }
 0x28f   : > { %726 = vrsqrt.f32 %v428_v51 }
 0x295   : > { %v725_v52 = vpop.eup %724 }
 0x296   : > { %v431_v53 = vmul.f32 %v725_v52, %v417_v41 }
 0x298   : > { %v437_v54 = vmul.f32 %v436_v23, %v431_v53 }
 0x299   : > { %v727_v55 = vpop.eup %726 }
 0x29a   : > { %v443_v56 = vadd.f32 %v442_v24, %v437_v54  ;;  %v432_v57 = vmul.f32 %v727_v55, %v418_v44 }
 0x29c   : > { %v438_v58 = vmul.f32 %v436_v23, %v432_v57 }
 0x29e   : > { %v444_v59 = vadd.f32 %v442_v24, %v438_v58 }
 0x2a0   : > { %v608_v60 = vpack.c.bf16 %v444_v59, %v443_v56 }
 0x2a2   : > { %609 = vst [vmem:[%s216_s17] sm:$0xff] %v608_v60  }
 0x2a3   : > { %827 = shalt.err (!%p824_p2)
}
 0x2a4   : > { %s828_s10 = scalar_lea.hbm %s1109_s23, 128  ;;  %s832_s22 = scalar_lea.hbm %s1158_s3, 256 }
 0x2a5   : > { %p829_p13 = scmp.ne.s32.totalorder %s1109_s23, %s828_s10  ;;  %p833_p4 = scmp.lt.u32.totalorder %s1109_s23, %s1158_s3 }
 0x2a6   : > { %p834_p5 = scmp.lt.u32.totalorder %s832_s22, %s828_s10  ;;  %p836_p11 = scmp.lt.u32.totalorder %s828_s10, %s1109_s23 }
 0x2a7   : > { %p830_p6 = pnand %p829_p13, %p1172_p0 }
 0x2a8   : > { %p835_p8 = por %p834_p5, %p833_p4 }
 0x2a9   : > { %p831_p10 = pneg %p830_p6 }
 0x2aa   : > { %p837_p1 = por %p836_p11, %p835_p8 }
 0x2ac   : > { %p838_p3 = pnand %p837_p1, %p831_p10 }
 0x2ae   : > { %841 = shalt.err (!%p838_p3)
}
 0x2af   : > { %s894_s18 = smov 64   ;;  %s895_s20 = smov 4  }
 0x2b0   : > { %642 = dma.vmem_to_hbm [thread:$0]  (%p1172_p0), %s1111_s24, 128, %s1109_s23, %s456_s5, %s894_s18, %s894_s18, %s895_s20  }
 0x2b1 PF: > { %s484_s17 = sand.u32 1, %s872_s12   ;;  %p1173_p7 = scmp.ne.s32.totalorder %s1163_s19, 0 }
 0x2b2   : > { %p1174_p9 = scmp.ge.s32.totalorder %s884_s15, 2  ;;  %s485_s26 = scalar_lea.sflag [#allocation4], %s484_s17 }
 0x2b4   : > { %p656_p12 = pnand %p1174_p9, %p1173_p7 }
 0x2b6   : > { %867 = dma.done.wait (!%p656_p12), %s485_s26, 128  }
 0x2b7   : > { %869 = vsyncadd (!%p656_p12), %s485_s26, 4294967168  ;;  %p17_p2 = scmp.ge.s32.totalorder %s1026_s4, 4   ;;  %s1175_s12 = smov %s876_s13 }
 0x2b8   : > { %s1176_s13 = smov %s880_s14  ;;  %s1177_s14 = smov %s1042_s7 }
 0x2b9   : > { %s1178_s15 = smov %s1026_s4  ;;  %19 = sbr.rel (!%p17_p2) target bundleno = 6 (0x6), region = 85 }
 0x2c0   :  { %490 = vsyncpa [#allocation3], 1 }
 0x2c1   :  { %492 = vsyncpa [#allocation3 + $0x1], 1 }
 0x2c2   :  { %493 = vsyncpa [#allocation6], 1 }
 0x2c3   :  { %494 = vsyncpa [#allocation4], 1 }
 0x2c4   :  { %496 = vsyncpa [#allocation4 + $0x1], 1 }

</bundles_post_ra>
